<compile_context>
chip_gen: v6e
topology: v6e:2x2x1
jax: 0.10.0
libtpu: 0.0.40
codegen_flags: <defaults>
</compile_context>

<pallas_src>
import jax
import jax.numpy as jnp
from jax.experimental import pallas as pl
from jax.experimental.pallas import tpu as pltpu


def _gat_head_kernel(seq_ref, f1_ref, f2_ref, bias_ref, adj_ref, o_ref):
    # seq_ref:  (Np, Np)      f32|bf16  resident seq_fts (conv1 output), zero-padded
    # f1_ref:   (TILE_M, 1)   f32       row-tile slice of f_1 (column vector)
    # f2_ref:   (1, Np)       f32       full f_2 row
    # bias_ref: (1, Np)       f32       0 on valid key columns, -1e30 on padded ones
    # adj_ref:  (TILE_M, Np)  bf16      row tile of the adjacency mask
    # o_ref:    (TILE_M, Np)  f32       row tile of the output
    adj = adj_ref[...].astype(jnp.float32)

    # logits = adj*f1 + adj*f2^T == adj * (f1 + f2^T)  (factored: one fewer N^2 mul)
    logits = adj * (f1_ref[...] + f2_ref[...])

    # leaky_relu (PyTorch default negative_slope = 0.01)
    act = jnp.where(logits > 0, logits, 0.01 * logits)

    # Masked softmax over keys: padded columns carry a -1e30 additive bias, so their
    # exp underflows to exactly 0 -- no iota / selects needed.  (Valid columns always
    # exist since N >= 1, so the row max stays finite.)
    act = act + bias_ref[...]
    m = jnp.max(act, axis=-1, keepdims=True)
    e = jnp.exp(act - m)
    denom = jnp.sum(e, axis=-1, keepdims=True)
    coefs = e * pl.reciprocal(denom, approx=True)            # (TILE_M, Np)

    # vals = coefs @ seq_fts   (reference matmul requires C_out == N).
    # seq_ref's dtype picks the MXU operand precision (bf16 fast path / f32 exact).
    seq = seq_ref[...]
    vals = jnp.dot(coefs.astype(seq.dtype), seq,
                   preferred_element_type=jnp.float32)       # (TILE_M, Np) f32

    # ELU (alpha = 1).  exp(min(v,0)) - 1 == expm1(v) for v <= 0 to within ~1e-7 abs;
    # the clamp keeps the discarded branch from overflowing.
    o_ref[...] = jnp.where(vals > 0, vals,
                           jnp.exp(jnp.minimum(vals, 0.0)) - 1.0).astype(o_ref.dtype)


def _round_up(v, m):
    return ((v + m - 1) // m) * m


def _vmem_capacity_bytes(default=64 * 1024 * 1024):
    try:
        return int(getattr(pltpu.get_tpu_info(), "vmem_capacity_bytes", default))
    except Exception:
        return default


def sparse_attention_head(x, edge_index, adj_mat, params, *, matmul_in_bf16=True):
    """Forward pass of SparseAttentionHead (dropout=0.0, residual=False).

    x: (1, C_in, N) NCW.  edge_index is accepted but unused (as in the reference).
    matmul_in_bf16: run the dominant coefs @ seq_fts matmul with bf16 MXU operands
    (f32 accumulation) -- ~3x MXU throughput on v6e/v7x, ~2^-8-relative rounding.
    Set False for f32-level accuracy (MXU uses the multi-pass f32 path).
    """
    del edge_index  # unused in the PyTorch forward as well

    w1 = params["w1"].astype(jnp.float32)   # (C_out, C_in)   conv1 weight (no bias)
    a1 = params["a1"].astype(jnp.float32)   # (1, C_out)      f1 weight
    b1 = params["b1"].astype(jnp.float32)   # (1, 1)          f1 bias
    a2 = params["a2"].astype(jnp.float32)   # (1, C_out)      f2 weight
    b2 = params["b2"].astype(jnp.float32)   # (1, 1)          f2 bias

    assert x.ndim == 3 and x.shape[0] == 1
    _, c_in, n = x.shape
    c_out = w1.shape[0]
    assert c_out == n, (
        "reference matmul(coefs, seq_fts.squeeze()) requires out_channels == nb_nodes")

    # ---- Skinny (K = C_in) matmuls done ONCE in XLA, not per grid step. ---------
    x0 = x[0].astype(jnp.float32)                             # (C_in, N)
    seq_fts = w1 @ x0                                         # (N, N)   conv1
    f1 = (a1 @ seq_fts + b1[0, 0]).reshape(n, 1)              # (N, 1)
    f2 = (a2 @ seq_fts + b2[0, 0]).reshape(1, n)              # (1, N)

    # ---- Padding / tiling. ------------------------------------------------------
    LANE, SUB = 128, 8
    n_p = _round_up(n, LANE)                                  # lane-dense key/col dim
    seq_dtype = jnp.bfloat16 if matmul_in_bf16 else jnp.float32
    seq_bytes = 2 * n_p * n_p * jnp.dtype(seq_dtype).itemsize  # resident, 2x-buffered

    vmem_budget = int(0.80 * _vmem_capacity_bytes())

    def _tile_bytes(t):
        # adj tile (bf16, double-buffered) + out tile (f32, double-buffered)
        # + ~6 live f32 elementwise temporaries (adj upcast, logits/act, e, coefs,
        #   coefs cast, vals) + small f1/f2/bias buffers.
        return t * n_p * (2 * 2 + 2 * 4 + 6 * 4) + 4 * (2 * t + 4 * n_p)

    # Row tile: ~half the valid rows (>= 2 grid steps so both v7x TensorCores get
    # work) capped at the 256-wide MXU M dimension; shrink if the corrected VMEM
    # budget is exceeded.
    tile_m = min(256, _round_up(max(1, (n + 1) // 2), SUB))
    tile_m = max(tile_m, 16 if n > SUB else SUB)              # bf16-tile-friendly rows
    while tile_m > 16 and seq_bytes + _tile_bytes(tile_m) + (2 << 20) > vmem_budget:
        tile_m = _round_up(tile_m // 2, SUB)

    n_rows = pl.cdiv(n, tile_m) * tile_m                      # only VALID row tiles
    grid_m = n_rows // tile_m

    est = seq_bytes + _tile_bytes(tile_m)
    vmem_limit = int(min(vmem_budget, max(32 * 1024 * 1024, est + (4 << 20))))

    # ---- Zero-pad operands; padded key columns get an additive -1e30 bias. ------
    seq_p = jnp.zeros((n_p, n_p), seq_dtype).at[:n, :n].set(seq_fts.astype(seq_dtype))
    f1_p = jnp.zeros((n_rows, 1), jnp.float32).at[:n, :].set(f1)
    f2_p = jnp.zeros((1, n_p), jnp.float32).at[:, :n].set(f2)
    bias = jnp.where(jnp.arange(n_p) < n, 0.0, -1e30).astype(jnp.float32).reshape(1, n_p)
    # adj is a 0/1 mask -> exactly representable in bf16; halves the dominant HBM read.
    adj_p = jnp.zeros((n_rows, n_p), jnp.bfloat16).at[:n, :n].set(
        adj_mat.astype(jnp.bfloat16))

    out_p = pl.pallas_call(
        _gat_head_kernel,
        out_shape=jax.ShapeDtypeStruct((n_rows, n_p), jnp.float32),
        grid=(grid_m,),
        in_specs=[
            pl.BlockSpec((n_p, n_p), lambda i: (0, 0)),       # seq_fts (resident slab)
            pl.BlockSpec((tile_m, 1), lambda i: (i, 0)),      # f1 column (row-tiled)
            pl.BlockSpec((1, n_p), lambda i: (0, 0)),         # f2 row
            pl.BlockSpec((1, n_p), lambda i: (0, 0)),         # softmax column bias
            pl.BlockSpec((tile_m, n_p), lambda i: (i, 0)),    # adj row tile (bf16)
        ],
        out_specs=pl.BlockSpec((tile_m, n_p), lambda i: (i, 0)),
        compiler_params=pltpu.CompilerParams(
            dimension_semantics=("parallel",),                # megacore-shardable
            vmem_limit_bytes=vmem_limit,
        ),
    )(seq_p, f1_p, f2_p, bias, adj_p)

    return out_p[:n, :n][None]                                # (1, N, N)


def _reference(x, adj_mat, params):
    """Pure-JAX mirror of the PyTorch forward for verification."""
    x0 = x[0].astype(jnp.float32)
    seq_fts = params["w1"] @ x0
    f1 = (params["a1"] @ seq_fts + params["b1"][0, 0]).reshape(-1, 1)   # (N, 1)
    f2 = (params["a2"] @ seq_fts + params["b2"][0, 0]).reshape(-1, 1)   # (N, 1)
    logits = adj_mat * f1 + adj_mat * f2.T
    act = jnp.where(logits > 0, logits, 0.01 * logits)
    coefs = jax.nn.softmax(act, axis=-1)
    vals = coefs @ seq_fts
    return jnp.where(vals > 0, vals, jnp.expm1(vals))[None]


if __name__ == "__main__":
    in_channels, out_channels, nb_nodes = 8, 16, 16  # out_channels == nb_nodes (required)

    key = jax.random.PRNGKey(0)
    k_x, k_w1, k_a1, k_b1, k_a2, k_b2, k_adj = jax.random.split(key, 7)

    # Deterministic synthetic parameters (not a checkpoint load).
    params = {
        "w1": jax.random.normal(k_w1, (out_channels, in_channels), jnp.float32) * 0.2,
        "a1": jax.random.normal(k_a1, (1, out_channels), jnp.float32) * 0.2,
        "b1": jax.random.normal(k_b1, (1, 1), jnp.float32) * 0.1,
        "a2": jax.random.normal(k_a2, (1, out_channels), jnp.float32) * 0.2,
        "b2": jax.random.normal(k_b2, (1, 1), jnp.float32) * 0.1,
    }

    x = jax.random.normal(k_x, (1, in_channels, nb_nodes), jnp.float32)
    # Dense 0/1 adjacency with self-loops.
    adj = (jax.random.uniform(k_adj, (nb_nodes, nb_nodes)) < 0.3).astype(jnp.float32)
    adj = jnp.maximum(adj, jnp.eye(nb_nodes, dtype=jnp.float32))
    # edge_index is accepted but unused by the reference forward.
    edge_index = jnp.stack(
        jnp.nonzero(adj, size=nb_nodes * nb_nodes, fill_value=0)).astype(jnp.int32)

    ref = _reference(x, adj, params)

    # f32 MXU-operand path: matches the f32 PyTorch reference tightly.
    out_f32 = jax.block_until_ready(
        sparse_attention_head(x, edge_index, adj, params, matmul_in_bf16=False))
    assert out_f32.shape == (1, nb_nodes, nb_nodes), out_f32.shape
    err_f32 = float(jnp.max(jnp.abs(out_f32 - ref)))
    assert jnp.allclose(out_f32, ref, atol=1e-3, rtol=1e-3), err_f32

    # bf16 MXU-operand fast path (perf review): ~2^-8-relative rounding on the
    # dominant coefs @ seq_fts matmul; validated at a bf16-appropriate tolerance.
    out_bf16 = jax.block_until_ready(
        sparse_attention_head(x, edge_index, adj, params, matmul_in_bf16=True))
    err_bf16 = float(jnp.max(jnp.abs(out_bf16 - ref)))
    assert jnp.allclose(out_bf16, ref, atol=2e-2, rtol=2e-2), err_bf16

    print("KERNEL_OK")
</pallas_src>

<mosaic_0001>
module attributes {stable_mosaic.version = 11 : i64} {
  func.func @_gat_head_kernel(%arg0: i32, %arg1: memref<128x128xf32, #tpu.memory_space<vmem>>, %arg2: memref<16x1xf32, #tpu.memory_space<vmem>>, %arg3: memref<1x128xf32, #tpu.memory_space<vmem>>, %arg4: memref<1x128xf32, #tpu.memory_space<vmem>>, %arg5: memref<16x128xbf16, #tpu.memory_space<vmem>>, %arg6: memref<16x128xf32, #tpu.memory_space<vmem>>) attributes {dimension_semantics = [#tpu.dimension_semantics<parallel>], iteration_bounds = array<i64: 1>, scalar_prefetch = 0 : i64, scratch_operands = 0 : i64, tpu.core_type = #tpu.core_type<tc>, window_params = [{pipeline_mode = #tpu.pipeline_mode<synchronous>, transform_indices = @transform_0, window_bounds = array<i64: 128, 128>}, {transform_indices = @transform_1, window_bounds = array<i64: 16, 1>}, {pipeline_mode = #tpu.pipeline_mode<synchronous>, transform_indices = @transform_2, window_bounds = array<i64: 1, 128>}, {pipeline_mode = #tpu.pipeline_mode<synchronous>, transform_indices = @transform_3, window_bounds = array<i64: 1, 128>}, {transform_indices = @transform_4, window_bounds = array<i64: 16, 128>}, {transform_indices = @transform_5, window_bounds = array<i64: 16, 128>}]} {
    %c0 = arith.constant 0 : index
    %c0_0 = arith.constant 0 : index
    %0 = vector.load %arg5[%c0, %c0_0] : memref<16x128xbf16, #tpu.memory_space<vmem>>, vector<16x128xbf16>
    %1 = arith.extf %0 : vector<16x128xbf16> to vector<16x128xf32>
    %c0_1 = arith.constant 0 : index
    %c0_2 = arith.constant 0 : index
    %2 = vector.load %arg2[%c0_1, %c0_2] : memref<16x1xf32, #tpu.memory_space<vmem>>, vector<16x1xf32>
    %c0_3 = arith.constant 0 : index
    %c0_4 = arith.constant 0 : index
    %3 = vector.load %arg3[%c0_3, %c0_4] : memref<1x128xf32, #tpu.memory_space<vmem>>, vector<1x128xf32>
    %4 = vector.broadcast %2 : vector<16x1xf32> to vector<16x128xf32>
    %5 = vector.broadcast %3 : vector<1x128xf32> to vector<16x128xf32>
    %6 = arith.addf %4, %5 : vector<16x128xf32>
    %7 = arith.mulf %1, %6 : vector<16x128xf32>
    %cst = arith.constant 0.000000e+00 : f32
    %8 = vector.broadcast %cst : f32 to vector<16x128xf32>
    %9 = arith.cmpf ogt, %7, %8 : vector<16x128xf32>
    %cst_5 = arith.constant 0.00999999977 : f32
    %10 = vector.broadcast %cst_5 : f32 to vector<16x128xf32>
    %11 = arith.mulf %10, %7 : vector<16x128xf32>
    %12 = arith.select %9, %7, %11 : vector<16x128xi1>, vector<16x128xf32>
    %c0_6 = arith.constant 0 : index
    %c0_7 = arith.constant 0 : index
    %13 = vector.load %arg4[%c0_6, %c0_7] : memref<1x128xf32, #tpu.memory_space<vmem>>, vector<1x128xf32>
    %14 = vector.broadcast %13 : vector<1x128xf32> to vector<16x128xf32>
    %15 = arith.addf %12, %14 : vector<16x128xf32>
    %cst_8 = arith.constant dense<0xFF800000> : vector<16xf32>
    %16 = vector.multi_reduction <maximumf>, %15, %cst_8 [1] : vector<16x128xf32> to vector<16xf32>
    %17 = vector.shape_cast %16 : vector<16xf32> to vector<16x1xf32>
    %18 = vector.broadcast %17 : vector<16x1xf32> to vector<16x128xf32>
    %19 = arith.subf %15, %18 : vector<16x128xf32>
    %20 = math.exp %19 : vector<16x128xf32>
    %cst_9 = arith.constant dense<0.000000e+00> : vector<16xf32>
    %21 = vector.multi_reduction <add>, %20, %cst_9 [1] : vector<16x128xf32> to vector<16xf32>
    %22 = vector.shape_cast %21 : vector<16xf32> to vector<16x1xf32>
    %23 = tpu.reciprocal %22 {approx = true} : vector<16x1xf32> -> vector<16x1xf32>
    %24 = vector.broadcast %23 : vector<16x1xf32> to vector<16x128xf32>
    %25 = arith.mulf %20, %24 : vector<16x128xf32>
    %c0_10 = arith.constant 0 : index
    %c0_11 = arith.constant 0 : index
    %26 = vector.load %arg1[%c0_10, %c0_11] : memref<128x128xf32, #tpu.memory_space<vmem>>, vector<128x128xf32>
    %cst_12 = arith.constant dense<0.000000e+00> : vector<16x128xf32>
    %27 = tpu.matmul %25, %26, %cst_12 {dimension_numbers = #tpu.dot_dimension_numbers<[1], [0], [0], [1], [0, 0, 1, 1], [], []>} : vector<16x128xf32>, vector<128x128xf32>, vector<16x128xf32> -> vector<16x128xf32>
    %cst_13 = arith.constant 0.000000e+00 : f32
    %28 = vector.broadcast %cst_13 : f32 to vector<16x128xf32>
    %29 = arith.cmpf ogt, %27, %28 : vector<16x128xf32>
    %cst_14 = arith.constant 0.000000e+00 : f32
    %30 = vector.broadcast %cst_14 : f32 to vector<16x128xf32>
    %31 = arith.minimumf %27, %30 : vector<16x128xf32>
    %32 = math.exp %31 : vector<16x128xf32>
    %cst_15 = arith.constant 1.000000e+00 : f32
    %33 = vector.broadcast %cst_15 : f32 to vector<16x128xf32>
    %34 = arith.subf %32, %33 : vector<16x128xf32>
    %35 = arith.select %29, %27, %34 : vector<16x128xi1>, vector<16x128xf32>
    %c0_16 = arith.constant 0 : index
    %c0_17 = arith.constant 0 : index
    %36 = vector.load %arg6[%c0_16, %c0_17] : memref<16x128xf32, #tpu.memory_space<vmem>>, vector<16x128xf32>
    tpu.vector_store %arg6[%c0_16, %c0_17], %35 {strides = array<i32>} : memref<16x128xf32, #tpu.memory_space<vmem>>, vector<16x128xf32>,
    return
  }
  func.func @transform_0(%arg0: i32) -> (i32, i32) {
    %c0_i32 = arith.constant 0 : i32
    %c0_i32_0 = arith.constant 0 : i32
    %c0_i32_1 = arith.constant 0 : i32
    return %c0_i32, %c0_i32_0 : i32, i32
  }
  func.func @transform_1(%arg0: i32) -> (i32, i32) {
    %c0_i32 = arith.constant 0 : i32
    %c0_i32_0 = arith.constant 0 : i32
    return %arg0, %c0_i32 : i32, i32
  }
  func.func @transform_2(%arg0: i32) -> (i32, i32) {
    %c0_i32 = arith.constant 0 : i32
    %c0_i32_0 = arith.constant 0 : i32
    %c0_i32_1 = arith.constant 0 : i32
    return %c0_i32, %c0_i32_0 : i32, i32
  }
  func.func @transform_3(%arg0: i32) -> (i32, i32) {
    %c0_i32 = arith.constant 0 : i32
    %c0_i32_0 = arith.constant 0 : i32
    %c0_i32_1 = arith.constant 0 : i32
    return %c0_i32, %c0_i32_0 : i32, i32
  }
  func.func @transform_4(%arg0: i32) -> (i32, i32) {
    %c0_i32 = arith.constant 0 : i32
    %c0_i32_0 = arith.constant 0 : i32
    return %arg0, %c0_i32 : i32, i32
  }
  func.func @transform_5(%arg0: i32) -> (i32, i32) {
    %c0_i32 = arith.constant 0 : i32
    %c0_i32_0 = arith.constant 0 : i32
    return %arg0, %c0_i32 : i32, i32
  }
}

</mosaic_0001>

<bundles_post_ra>
// kernel: tpu_custom_call.1
= control target key start
LH: loop header
LB: loop body
LE: loop exit
PB: predicated region body
PF: predicated region fallthrough
CT: control target
= control target key end

     0   :  { %10 = vsyncpa [#allocation3], 0  ;;  %s402_s0 = inlined_call_operand.hbm [shape: f32[128,128], index: 0, kind: input, shape index: {}]   ;;  %s403_s1 = inlined_call_operand.vmem [shape: f32[16,1], index: 1, kind: input, shape index: {}]   ;;  %s404_s2 = inlined_call_operand.vmem [shape: f32[1,128], index: 2, kind: input, shape index: {}]   ;;  %s405_s3 = inlined_call_operand.vmem [shape: f32[1,128], index: 3, kind: input, shape index: {}]   ;;  %s406_s4 = inlined_call_operand.vmem [shape: bf16[16,128], index: 4, kind: input, shape index: {}]   ;;  %s407_s5 = inlined_call_operand.hbm [shape: f32[16,128], index: 5, kind: output, shape index: {}]  }
   0x1   :  { %11 = vsyncpa [#allocation4], 0  ;;  %s340_s18 = smov [#allocation2]  }
   0x2   :  { %s17_s19 = sshll.u32 %s340_s18, 4  ;;  %s18_s19 = int_to_ptr.vmem [resolvable:$true] %s17_s19 }
   0x3   :  { %s304_s20 = scalar_lea.vmem %s18_s19, 2048  ;;  %p309_p1 = scmp.lt.s32.totalorder %s18_s19, %s18_s19 }
   0x4   :  { %p305_p0 = scmp.ne.s32.totalorder %s18_s19, %s304_s20  ;;  %p310_p2 = scmp.lt.s32.totalorder %s304_s20, %s304_s20 }
   0x6   :  { %p311_p3 = por %p310_p2, %p309_p1 }
   0x8   :  { %p312_p4 = pnand %p311_p3, %p305_p0 }
   0xa   :  { %315 = shalt.err (!%p312_p4)
}
   0xb   :  { %s341_s21 = smov 128   ;;  %s342_s22 = smov 8  }
   0xc   :  { %23 = dma.hbm_to_vmem [thread:$0]  %s402_s0, 2048, %s18_s19, [#allocation3], %s341_s21, %s341_s21, %s342_s22  }
   0xd   :  { %336 = dma.done.wait [#allocation3], 2048  }
   0xe   :  { %337 = vsyncadd [#allocation3], 4294965248  ;;  %v343_v0 = vmov 0   ;;  %v39_v1 = vld [vmem:[%s403_s1] sm:$0xff]  ;;  %v40_v2 = vld [vmem:[%s403_s1 + $0x8] sm:$0xff] }
   0xf   :  { %283 = vset.pattern.permute.xlu0 %v343_v0  ;;  %v222_v3 = vld [vmem:[%s406_s4] sm:$0xff]   ;;  %v110_v20 = vld [vmem:[#allocation2 + $0x78] sm:$0xff]  ;;  %v109_v21 = vld [vmem:[#allocation2 + $0x70] sm:$0xff] }
  0x10   :  { %44 = vperm.xlu0 %283, %v39_v1   ;;  %v217_v4 = vld [vmem:[%s404_s2] ss:$0 sm:$0xff]  ;;  %v223_v5 = vunpack.c.l.bf16 %v222_v3  ;;  %v224_v9 = vunpack.c.h.bf16 %v222_v3  ;;  %243 = vmatprep.subr.mxu0 %v110_v20  ;;  %v108_v22 = vld [vmem:[#allocation2 + $0x68] sm:$0xff]  ;;  %v106_v24 = vld [vmem:[#allocation2 + $0x58] sm:$0xff]  ;;  %s344_s2 = smov [#allocation5]  }
  0x11   :  { %v218_v13 = vld [vmem:[%s405_s3] ss:$0 sm:$0xff]  ;;  %244 = vmatpush3.msra.mxu0 %v110_v20  ;;  %v105_v25 = vld [vmem:[#allocation2 + $0x50] sm:$0xff]  ;;  %v104_v34 = vld [vmem:[#allocation2 + $0x48] sm:$0xff]  ;;  %s205_s3 = sshll.u32 %s344_s2, 4  ;;  %s206_s3 = int_to_ptr.vmem [resolvable:$true] %s205_s3 }
  0x12   :  { %245 = vmatprep.subr.mxu0 %v109_v21  ;;  %v107_v23 = vld [vmem:[#allocation2 + $0x60] sm:$0xff]  ;;  %v102_v36 = vld [vmem:[#allocation2 + $0x38] sm:$0xff]  ;;  %v101_v37 = vld [vmem:[#allocation2 + $0x30] sm:$0xff]  ;;  %s316_s4 = scalar_lea.vmem %s206_s3, 256  ;;  %p321_p6 = scmp.lt.s32.totalorder %s206_s3, %s206_s3 }
  0x13   :  { %246 = vmatpush3.msra.mxu0 %v109_v21  ;;  %v103_v35 = vld [vmem:[#allocation2 + $0x40] sm:$0xff]  ;;  %v100_v38 = vld [vmem:[#allocation2 + $0x28] sm:$0xff]  ;;  %v98_v40 = vld [vmem:[#allocation2 + $0x18] sm:$0xff]  ;;  %p317_p5 = scmp.ne.s32.totalorder %s206_s3, %s316_s4  ;;  %p322_p7 = scmp.lt.s32.totalorder %s316_s4, %s316_s4 }
  0x14   :  { %49 = vperm.xlu0 %283, %v40_v2   ;;  %247 = vmatprep.subr.mxu0 %v108_v22  ;;  %v99_v39 = vld [vmem:[#allocation2 + $0x20] sm:$0xff]  ;;  %v97_v41 = vld [vmem:[#allocation2 + $0x10] sm:$0xff]  ;;  %v96_v42 = vld [vmem:[#allocation2 + $0x8] sm:$0xff] }
  0x15   :  { %248 = vmatpush3.msra.mxu0 %v108_v22  ;;  %v95_v43 = vld [vmem:[#allocation2] sm:$0xff]  ;;  %p323_p8 = por %p322_p7, %p321_p6 }
  0x16   :  { %249 = vmatprep.subr.mxu0 %v107_v23 }
  0x17   :  { %250 = vmatpush3.msra.mxu0 %v107_v23  ;;  %p324_p9 = pnand %p323_p8, %p317_p5 }
  0x18   :  { %251 = vmatprep.subr.mxu0 %v106_v24 }
  0x19   :  { %252 = vmatpush3.msra.mxu0 %v106_v24 }
  0x1a   :  { %253 = vmatprep.subr.mxu0 %v105_v25 }
  0x1b   :  { %254 = vmatpush3.msra.mxu0 %v105_v25 }
  0x1c   :  { %255 = vmatprep.subr.mxu0 %v104_v34 }
  0x1d   :  { %256 = vmatpush3.msra.mxu0 %v104_v34 }
  0x1e   :  { %257 = vmatprep.subr.mxu0 %v103_v35 }
  0x1f   :  { %258 = vmatpush3.msra.mxu0 %v103_v35 }
  0x20   :  { %259 = vmatprep.subr.mxu0 %v102_v36 }
  0x21   :  { %260 = vmatpush3.msra.mxu0 %v102_v36 }
  0x22   :  { %261 = vmatprep.subr.mxu0 %v101_v37 }
  0x23   :  { %262 = vmatpush3.msra.mxu0 %v101_v37 }
  0x24   :  { %263 = vmatprep.subr.mxu0 %v100_v38 }
  0x25   :  { %264 = vmatpush3.msra.mxu0 %v100_v38 }
  0x26   :  { %265 = vmatprep.subr.mxu0 %v99_v39 }
  0x27   :  { %266 = vmatpush3.msra.mxu0 %v99_v39 }
  0x28   :  { %267 = vmatprep.subr.mxu0 %v98_v40 }
  0x29   :  { %268 = vmatpush3.msra.mxu0 %v98_v40 }
  0x2a   :  { %269 = vmatprep.subr.mxu0 %v97_v41 }
  0x2b   :  { %270 = vmatpush3.msra.mxu0 %v97_v41 }
  0x2c   :  { %271 = vmatprep.subr.mxu0 %v96_v42 }
  0x2d   :  { %272 = vmatpush3.msra.mxu0 %v96_v42 }
  0x2e   :  { %273 = vmatprep.subr.mxu0 %v95_v43 }
  0x2f   :  { %274 = vmatpush3.msra.mxu0 %v95_v43 }
  0x8b   :  { %v45_v6 = vpop.permute.xlu0 %44 }
  0x8c   :  { %v58_v7 = vadd.f32 %v217_v4, %v45_v6 }
  0x8e   :  { %v60_v8 = vmul.f32 %v223_v5, %v58_v7 }
  0x8f   :  { %v50_v10 = vpop.permute.xlu0 %49 }
  0x90   :  { %v59_v11 = vadd.f32 %v217_v4, %v50_v10  ;;  %vm62_vm0 = vcmp.gt.f32.partialorder %v60_v8, 0.0  ;;  %v64_v12 = vmul.f32 0.01, %v60_v8 }
  0x92   :  { %v61_v14 = vmul.f32 %v224_v9, %v59_v11  ;;  %v66_v15 = vsel %vm62_vm0, %v60_v8, %v64_v12 }
  0x93   :  { %v75_v16 = vadd.f32 %v218_v13, %v66_v15 }
  0x94   :  { %vm63_vm1 = vcmp.gt.f32.partialorder %v61_v14, 0.0  ;;  %v65_v17 = vmul.f32 0.01, %v61_v14 }
  0x95   :  { %77 = vmax.xlane.f32.xlu1 %v75_v16 }
  0x96   :  { %v67_v18 = vsel %vm63_vm1, %v61_v14, %v65_v17 }
  0x97   :  { %v76_v19 = vadd.f32 %v218_v13, %v67_v18 }
  0x99   :  { %79 = vmax.xlane.f32.xlu1 %v76_v19 }
 0x11e   :  { %v78_v26 = vpop.xlane.xlu1 %77 }
 0x11f   :  { %v81_v27 = vsub.f32 %v75_v16, %v78_v26 }
 0x121   :  { %v83_v28 = vmul.f32 1.442695, %v81_v27 }
 0x122   :  { %v80_v29 = vpop.xlane.xlu1 %79 }
 0x123   :  { %284 = vpow2.f32 %v83_v28  ;;  %v82_v30 = vsub.f32 %v76_v19, %v80_v29 }
 0x125   :  { %v85_v31 = vmul.f32 1.442695, %v82_v30 }
 0x127   :  { %286 = vpow2.f32 %v85_v31 }
 0x130   :  { %v285_v32 = vpop.eup %284 }
 0x131   :  { %87 = vadd.xlane.f32.xlu0 %v285_v32 }
 0x134   :  { %v287_v33 = vpop.eup %286 }
 0x135   :  { %89 = vadd.xlane.f32.xlu1 %v287_v33 }
 0x1ba   :  { %v88_v44 = vpop.xlane.xlu0 %87 }
 0x1bb   :  { %288 = vrcp.f32 %v88_v44 }
 0x1be   :  { %v90_v45 = vpop.xlane.xlu1 %89 }
 0x1bf   :  { %290 = vrcp.f32 %v90_v45 }
 0x1c8   :  { %v289_v46 = vpop.eup %288 }
 0x1c9   :  { %v93_v47 = vmul.f32 %v289_v46, %v285_v32 }
 0x1cb   :  { %275 = vmatprep.mubr.f32.mxu0 %v93_v47 }
 0x1cc   :  { %v291_v48 = vpop.eup %290 }
 0x1cd   :  { %v94_v49 = vmul.f32 %v291_v48, %v287_v33 }
 0x1cf   :  { %276 = vmatmul.mubr.f32.vlgmr.msra.gmra.mxu0 %v94_v49 }
 0x28f   :  { %v277_v50 = vpop.f32.mrf.mxu0 }
 0x290   :  { %v189_v51 = vmin.f32 %v277_v50, 0.0  ;;  %vm187_vm2 = vcmp.gt.f32.partialorder %v277_v50, 0.0 }
 0x291   :  { %v177_v52 = vpop.f32.mrf.mxu0 }
 0x292   :  { %v192_v53 = vmul.f32 1.442695, %v189_v51  ;;  %v188_v54 = vmin.f32 %v177_v52, 0.0  ;;  %vm186_vm3 = vcmp.gt.f32.partialorder %v177_v52, 0.0 }
 0x294   :  { %292 = vpow2.f32 %v192_v53  ;;  %v190_v55 = vmul.f32 1.442695, %v188_v54 }
 0x296   :  { %294 = vpow2.f32 %v190_v55 }
 0x2a1   :  { %v293_v56 = vpop.eup %292 }
 0x2a2   :  { %v220_v57 = vadd.f32 -1.0, %v293_v56 }
 0x2a3   :  { %v295_v58 = vpop.eup %294 }
 0x2a4   :  { %v197_v59 = vsel %vm187_vm2, %v277_v50, %v220_v57  ;;  %v219_v60 = vadd.f32 -1.0, %v295_v58 }
 0x2a5   :  { %199 = vst [vmem:[#allocation5 + $0x8] sm:$0xff] %v197_v59 }
 0x2a6   :  { %v196_v61 = vsel %vm186_vm3, %v177_v52, %v219_v60 }
 0x2a7   :  { %198 = vst [vmem:[#allocation5] sm:$0xff] %v196_v61 }
 0x2a8   :  { %327 = shalt.err (!%p324_p9)
}
 0x2a9   :  { %211 = dma.vmem_to_hbm [thread:$0]  %s206_s3, 256, %s407_s5, [#allocation4], %s341_s21, %s341_s21, %s342_s22  }
 0x2aa   :  { %338 = dma.done.wait [#allocation4], 256  }
 0x2ab   :  { %339 = vsyncadd [#allocation4], 4294967040 }
 0x2ac   :  { %215 = vsyncpa [#allocation3], 1 }
 0x2ad   :  { %216 = vsyncpa [#allocation4], 1 }

</bundles_post_ra>
